<compile_context>
chip_gen: v6e
topology: v6e:2x2x1
jax: 0.10.0
libtpu: 0.0.40
codegen_flags: <defaults>
</compile_context>

<pallas_src>
import functools

import jax
import jax.numpy as jnp
from jax.experimental import pallas as pl
from jax.experimental.pallas import tpu as pltpu

LANE = 128             # TPU lane width (last dim)
MAX_BLOCK_ROWS = 2048  # sublane rows per grid step (multiple of 8); 1 MiB/f32 buffer


def _round_up(a, b):
    return (a + b - 1) // b * b


def _bce_loss(x, t):
    # Numerically stable BCE-with-logits, 2 EUP ops per element:
    #   loss = max(x, 0) - x*t + log(1 + exp(-|x|))
    # (identical to the PyTorch reference formula with max_val = clamp(-x, 0)).
    return jnp.maximum(x, 0.0) - x * t + jnp.log(1.0 + jnp.exp(-jnp.abs(x)))


def _bce_reduce_kernel(x_ref, t_ref, acc_ref, *, n, block_rows, inner, needs_mask):
    i = pl.program_id(0)  # "parallel" axis (megacore split on v7x)
    j = pl.program_id(1)  # "arbitrary" reduction axis

    @pl.when(j == 0)
    def _():
        acc_ref[...] = jnp.zeros_like(acc_ref)

    x = x_ref[...].astype(jnp.float32)
    t = t_ref[...].astype(jnp.float32)
    loss = _bce_loss(x, t)

    if needs_mask:
        # Zero out padded tail elements; mask built in-kernel (no HBM stream).
        block_idx = i * inner + j
        base = block_idx * (block_rows * LANE)
        row = jax.lax.broadcasted_iota(jnp.int32, (block_rows, LANE), 0)
        lane = jax.lax.broadcasted_iota(jnp.int32, (block_rows, LANE), 1)
        idx = base + row * LANE + lane
        loss = jnp.where(idx < n, loss, 0.0)

    # Wide, vreg-shaped accumulator: per-step accumulation is pure VPU adds;
    # the single cross-lane reduce happens in the wrapper on (outer, 8, 128).
    partial = loss.reshape(block_rows // 8, 8, LANE).sum(axis=0)
    acc_ref[...] += partial.reshape(1, 8, LANE)


def _bce_none_kernel(x_ref, t_ref, o_ref):
    x = x_ref[...].astype(jnp.float32)
    t = t_ref[...].astype(jnp.float32)
    o_ref[...] = _bce_loss(x, t).astype(o_ref.dtype)


@functools.partial(jax.jit, static_argnames=("reduction",))
def bce_with_logits_loss(x, t, reduction="mean"):
    if reduction not in ("sum", "mean", "none"):
        raise ValueError(f"Unsupported reduction {reduction}")
    if x.shape != t.shape:
        raise ValueError("Target size must be the same as input size")

    orig_shape = x.shape
    n = x.size

    rows = pl.cdiv(n, LANE)
    block_rows = min(MAX_BLOCK_ROWS, _round_up(rows, 8))
    num_blocks = pl.cdiv(rows, block_rows)

    if reduction == "none":
        outer = 1
    else:
        # Split across the two v7x TensorCores when there is enough work.
        outer = 2 if num_blocks >= 2 else 1
    num_blocks_p = _round_up(num_blocks, outer)
    inner = num_blocks_p // outer
    rows_p = num_blocks_p * block_rows
    pad = rows_p * LANE - n

    # Keep native dtype; only pad when actually needed.
    xf = x.reshape(-1)
    tf = t.reshape(-1)
    if pad:
        xf = jnp.pad(xf, (0, pad))
        tf = jnp.pad(tf, (0, pad))
    xf = xf.reshape(rows_p, LANE)
    tf = tf.reshape(rows_p, LANE)

    if reduction == "none":
        blk = pl.BlockSpec((block_rows, LANE), lambda i: (i, 0))
        loss_padded = pl.pallas_call(
            _bce_none_kernel,
            out_shape=jax.ShapeDtypeStruct((rows_p, LANE), x.dtype),
            grid_spec=pltpu.PrefetchScalarGridSpec(
                num_scalar_prefetch=0,
                grid=(num_blocks_p,),
                in_specs=[blk, blk],
                out_specs=blk),
            compiler_params=pltpu.CompilerParams(
                dimension_semantics=("parallel",)),
        )(xf, tf)
        return loss_padded.reshape(-1)[:n].reshape(orig_shape)

    # 'sum' / 'mean': no per-element output at all, only tiny partial sums.
    kernel = functools.partial(
        _bce_reduce_kernel,
        n=n, block_rows=block_rows, inner=inner, needs_mask=(pad != 0))
    blk = pl.BlockSpec((block_rows, LANE), lambda i, j: (i * inner + j, 0))
    psums = pl.pallas_call(
        kernel,
        out_shape=jax.ShapeDtypeStruct((outer, 8, LANE), jnp.float32),
        grid_spec=pltpu.PrefetchScalarGridSpec(
            num_scalar_prefetch=0,
            grid=(outer, inner),
            in_specs=[blk, blk],
            out_specs=pl.BlockSpec((1, 8, LANE), lambda i, j: (i, 0, 0))),
        compiler_params=pltpu.CompilerParams(
            dimension_semantics=("parallel", "arbitrary")),
    )(xf, tf)

    total = jnp.sum(psums)
    if reduction == "sum":
        return total
    return total / jnp.float32(n)


class BCEWithLogitsLossPallas:
    """Pallas equivalent of BCEWithLogitsLoss_(weight=None, pos_weight=None)."""

    def __init__(self, weight=None, reduction="mean", pos_weight=None):
        if reduction not in ("sum", "mean", "none"):
            raise ValueError(f"Unsupported reduction {reduction}")
        if weight is not None or pos_weight is not None:
            # TODO(synk): non-None weight / pos_weight (extra elementwise scale) not implemented.
            raise NotImplementedError("weight / pos_weight are not supported")
        self.reduction = reduction

    def __call__(self, input, target):
        return bce_with_logits_loss(input, target, reduction=self.reduction)


def _reference(x, t, reduction="mean"):
    x = x.astype(jnp.float32)
    t = t.astype(jnp.float32)
    max_val = jnp.maximum(-x, 0.0)
    loss = x - x * t + max_val + jnp.log(jnp.exp(-max_val) + jnp.exp(-x - max_val))
    if reduction == "none":
        return loss
    if reduction == "sum":
        return jnp.sum(loss)
    return jnp.mean(loss)


if __name__ == "__main__":
    key = jax.random.PRNGKey(0)
    k1, k2, k3, k4 = jax.random.split(key, 4)

    # Shapes consistent with a YOLO-head objectness map: (N, C, H, W)
    x = jax.random.normal(k1, (2, 4, 16, 16), dtype=jnp.float32)
    t = jax.random.uniform(k2, (2, 4, 16, 16), dtype=jnp.float32)

    loss_fn = BCEWithLogitsLossPallas(reduction="mean")
    out = jax.block_until_ready(loss_fn(x, t))
    ref = _reference(x, t, "mean")
    assert jnp.allclose(out, ref, rtol=1e-5, atol=1e-5), (out, ref)

    # 'sum' and 'none' paths
    out_sum = jax.block_until_ready(bce_with_logits_loss(x, t, reduction="sum"))
    assert jnp.allclose(out_sum, _reference(x, t, "sum"), rtol=1e-5, atol=1e-4)

    out_none = jax.block_until_ready(bce_with_logits_loss(x, t, reduction="none"))
    assert jnp.allclose(out_none, _reference(x, t, "none"), rtol=1e-5, atol=1e-5)

    # Larger, non-lane-aligned shape: exercises the in-kernel padding mask and
    # the 2-wide parallel (per-TensorCore partial sum) grid.
    xb = jax.random.normal(k3, (2, 4, 150, 150), dtype=jnp.float32)
    tb = jax.random.uniform(k4, (2, 4, 150, 150), dtype=jnp.float32)
    out_b = jax.block_until_ready(bce_with_logits_loss(xb, tb, reduction="mean"))
    ref_b = _reference(xb, tb, "mean")
    assert jnp.allclose(out_b, ref_b, rtol=1e-4, atol=1e-4), (out_b, ref_b)

    print("KERNEL_OK")
</pallas_src>

<mosaic_0001>
module attributes {stable_mosaic.version = 11 : i64} {
  func.func @_bce_reduce_kernel(%arg0: i32, %arg1: i32, %arg2: memref<16x128xf32, #tpu.memory_space<vmem>>, %arg3: memref<16x128xf32, #tpu.memory_space<vmem>>, %arg4: memref<1x8x128xf32, #tpu.memory_space<vmem>>) attributes {dimension_semantics = [#tpu.dimension_semantics<parallel>, #tpu.dimension_semantics<arbitrary>], iteration_bounds = array<i64: 1, 1>, scalar_prefetch = 0 : i64, scratch_operands = 0 : i64, tpu.core_type = #tpu.core_type<tc>, window_params = [{transform_indices = @transform_0, window_bounds = array<i64: 16, 128>}, {transform_indices = @transform_1, window_bounds = array<i64: 16, 128>}, {transform_indices = @transform_2, window_bounds = array<i64: 1, 8, 128>}]} {
    %c0_i32 = arith.constant 0 : i32
    %0 = arith.cmpi eq, %arg1, %c0_i32 : i32
    %1 = arith.extui %0 : i1 to i32
    %c0_i32_0 = arith.constant 0 : i32
    %2 = arith.cmpi ne, %1, %c0_i32_0 : i32
    scf.if %2 {
      %cst_13 = arith.constant 0.000000e+00 : f32
      %23 = vector.broadcast %cst_13 : f32 to vector<1x8x128xf32>
      %c0_14 = arith.constant 0 : index
      %c0_15 = arith.constant 0 : index
      %c0_16 = arith.constant 0 : index
      %24 = vector.load %arg4[%c0_14, %c0_15, %c0_16] : memref<1x8x128xf32, #tpu.memory_space<vmem>>, vector<1x8x128xf32>
      tpu.vector_store %arg4[%c0_14, %c0_15, %c0_16], %23 {strides = array<i32>} : memref<1x8x128xf32, #tpu.memory_space<vmem>>, vector<1x8x128xf32>,
    } else {
    }
    %c0 = arith.constant 0 : index
    %c0_1 = arith.constant 0 : index
    %3 = vector.load %arg2[%c0, %c0_1] : memref<16x128xf32, #tpu.memory_space<vmem>>, vector<16x128xf32>
    %c0_2 = arith.constant 0 : index
    %c0_3 = arith.constant 0 : index
    %4 = vector.load %arg3[%c0_2, %c0_3] : memref<16x128xf32, #tpu.memory_space<vmem>>, vector<16x128xf32>
    %cst = arith.constant 0.000000e+00 : f32
    %5 = vector.broadcast %cst : f32 to vector<16x128xf32>
    %6 = arith.maximumf %3, %5 : vector<16x128xf32>
    %7 = arith.mulf %3, %4 : vector<16x128xf32>
    %8 = arith.subf %6, %7 : vector<16x128xf32>
    %9 = math.absf %3 : vector<16x128xf32>
    %cst_4 = arith.constant 0.000000e+00 : f32
    %10 = vector.broadcast %cst_4 : f32 to vector<16x128xf32>
    %11 = arith.subf %10, %9 : vector<16x128xf32>
    %12 = math.exp %11 : vector<16x128xf32>
    %cst_5 = arith.constant 1.000000e+00 : f32
    %13 = vector.broadcast %cst_5 : f32 to vector<16x128xf32>
    %14 = arith.addf %13, %12 : vector<16x128xf32>
    %15 = math.log %14 : vector<16x128xf32>
    %16 = arith.addf %8, %15 : vector<16x128xf32>
    %17 = vector.shape_cast %16 : vector<16x128xf32> to vector<2x8x128xf32>
    %cst_6 = arith.constant dense<0.000000e+00> : vector<8x128xf32>
    %18 = vector.multi_reduction <add>, %17, %cst_6 [0] : vector<2x8x128xf32> to vector<8x128xf32>
    %c0_7 = arith.constant 0 : index
    %c0_8 = arith.constant 0 : index
    %c0_9 = arith.constant 0 : index
    %19 = vector.load %arg4[%c0_7, %c0_8, %c0_9] : memref<1x8x128xf32, #tpu.memory_space<vmem>>, vector<1x8x128xf32>
    %20 = vector.shape_cast %18 : vector<8x128xf32> to vector<1x8x128xf32>
    %21 = arith.addf %19, %20 : vector<1x8x128xf32>
    %c0_10 = arith.constant 0 : index
    %c0_11 = arith.constant 0 : index
    %c0_12 = arith.constant 0 : index
    %22 = vector.load %arg4[%c0_10, %c0_11, %c0_12] : memref<1x8x128xf32, #tpu.memory_space<vmem>>, vector<1x8x128xf32>
    tpu.vector_store %arg4[%c0_10, %c0_11, %c0_12], %21 {strides = array<i32>} : memref<1x8x128xf32, #tpu.memory_space<vmem>>, vector<1x8x128xf32>,
    return
  }
  func.func @transform_0(%arg0: i32, %arg1: i32) -> (i32, i32) {
    %c1_i32 = arith.constant 1 : i32
    %0 = arith.muli %arg0, %c1_i32 : i32
    %1 = arith.addi %0, %arg1 : i32
    %c0_i32 = arith.constant 0 : i32
    %c0_i32_0 = arith.constant 0 : i32
    return %1, %c0_i32 : i32, i32
  }
  func.func @transform_1(%arg0: i32, %arg1: i32) -> (i32, i32) {
    %c1_i32 = arith.constant 1 : i32
    %0 = arith.muli %arg0, %c1_i32 : i32
    %1 = arith.addi %0, %arg1 : i32
    %c0_i32 = arith.constant 0 : i32
    %c0_i32_0 = arith.constant 0 : i32
    return %1, %c0_i32 : i32, i32
  }
  func.func @transform_2(%arg0: i32, %arg1: i32) -> (i32, i32, i32) {
    %c0_i32 = arith.constant 0 : i32
    %c0_i32_0 = arith.constant 0 : i32
    %c0_i32_1 = arith.constant 0 : i32
    return %arg0, %c0_i32, %c0_i32_0 : i32, i32, i32
  }
}

</mosaic_0001>

<bundles_post_ra>
// kernel: bce_with_logits_loss.1
= control target key start
LH: loop header
LB: loop body
LE: loop exit
PB: predicated region body
PF: predicated region fallthrough
CT: control target
= control target key end

     0   :  { %s145_s0 = inlined_call_operand.vmem [shape: f32[16,128], index: 0, kind: input, shape index: {}]   ;;  %s146_s1 = inlined_call_operand.vmem [shape: f32[16,128], index: 1, kind: input, shape index: {}]   ;;  %s147_s2 = inlined_call_operand.vmem [shape: f32[1,8,128], index: 2, kind: output, shape index: {}]  }
   0x1   :  { %v60_v0 = vld [vmem:[%s145_s0] sm:$0xff]  ;;  %v61_v1 = vld [vmem:[%s145_s0 + $0x8] sm:$0xff] }
   0x2   :  { %v70_v2 = vand.u32 2147483647, %v60_v0  ;;  %v71_v3 = vand.u32 2147483647, %v61_v1  ;;  %v62_v12 = vld [vmem:[%s146_s1] sm:$0xff]  ;;  %v63_v13 = vld [vmem:[%s146_s1 + $0x8] sm:$0xff] }
   0x3   :  { %v64_v14 = vmax.f32 %v60_v0, 0.0  ;;  %v66_v15 = vmul.f32 %v62_v12, %v60_v0  ;;  %v65_v16 = vmax.f32 %v61_v1, 0.0  ;;  %v67_v17 = vmul.f32 %v63_v13, %v61_v1 }
   0x4   :  { %v72_v4 = vsub.f32 0.0, %v70_v2  ;;  %v73_v5 = vsub.f32 0.0, %v71_v3 }
   0x5   :  { %v68_v18 = vsub.f32 %v64_v14, %v66_v15  ;;  %v69_v20 = vsub.f32 %v65_v16, %v67_v17 }
   0x6   :  { %v74_v6 = vmul.f32 1.442695, %v72_v4  ;;  %v76_v7 = vmul.f32 1.442695, %v73_v5 }
   0x8   :  { %107 = vpow2.f32 %v74_v6 }
   0x9   :  { %109 = vpow2.f32 %v76_v7 }
  0x15   :  { %v108_v8 = vpop.eup %107 }
  0x16   :  { %v110_v9 = vpop.eup %109  ;;  %v78_v10 = vadd.f32 1.0, %v108_v8 }
  0x17   :  { %v79_v11 = vadd.f32 1.0, %v110_v9 }
  0x18   :  { %111 = vlog2.f32 %v78_v10 }
  0x19   :  { %113 = vlog2.f32 %v79_v11 }
  0x25   :  { %v112_v19 = vpop.eup %111 }
  0x26   :  { %v114_v21 = vpop.eup %113  ;;  %v81_v22 = vmul.f32 0.6931472, %v112_v19 }
  0x27   :  { %v83_v23 = vmul.f32 0.6931472, %v114_v21 }
  0x28   :  { %v84_v24 = vadd.f32 %v81_v22, %v68_v18 }
  0x29   :  { %v85_v25 = vadd.f32 %v83_v23, %v69_v20 }
  0x2b   :  { %v86_v26 = vadd.f32 %v85_v25, %v84_v24 }
  0x2d   :  { %89 = vst [vmem:[%s147_s2] sm:$0xff] %v86_v26 }

</bundles_post_ra>
